<compile_context>
chip_gen: v6e
topology: v6e:2x2x1
jax: 0.10.0
libtpu: 0.0.40
codegen_flags: <defaults>
</compile_context>

<pallas_src>
import jax
import jax.numpy as jnp
from jax import lax
from jax.experimental import pallas as pl
from jax.experimental.pallas import tpu as pltpu


def _round_up(x, m):
    return (x + m - 1) // m * m


def _seq_pool_kernel(lens_ref, x_ref, out_ref, acc_ref):
    # lens_ref: (Bp,) int32 in SMEM (scalar prefetch)
    # x_ref:    (tB, tT, D) embeds tile in VMEM
    # out_ref:  (tB, D) output tile (revisited across the T grid axis)
    # acc_ref:  (tB, D) float32 VMEM accumulator scratch
    b = pl.program_id(0)
    t = pl.program_id(1)
    n_t = pl.num_programs(1)
    tB, tT, D = x_ref.shape
    t0 = t * tT  # element offset of this T chunk

    @pl.when(t == 0)
    def _init():
        acc_ref[...] = jnp.zeros_like(acc_ref)

    # Timestep index in the embeds layout (sublane = T, lane = D): no
    # (B, T) -> (B, T, D) relayout of a separately-shaped mask needed.
    tt_idx = lax.broadcasted_iota(jnp.int32, (tT, D), 0) + t0

    for r in range(tB):  # static unroll; tB is small (8/16)
        length = lens_ref[b * tB + r]

        # Skip T chunks that are entirely masked for this row.
        @pl.when(t0 < length)
        def _row():
            mask = (tt_idx < length).astype(jnp.float32)
            chunk = x_ref[r].astype(jnp.float32)                      # (tT, D)
            partial = jnp.sum(chunk * mask, axis=0, keepdims=True)    # (1, D)
            acc_ref[r:r + 1, :] = acc_ref[r:r + 1, :] + partial       # f32 accum

    @pl.when(t == n_t - 1)
    def _finish():
        out_ref[...] = acc_ref[...].astype(out_ref.dtype)


def sequence_pooling(sequence_embeds, sequence_length, *, t_tile=None, b_tile=None):
    """sum_{t < length[b]} sequence_embeds[b, t, :]  ->  (B, D)"""
    B, T, D = sequence_embeds.shape
    dtype = sequence_embeds.dtype
    itemsize = jnp.dtype(dtype).itemsize
    sub = {4: 8, 2: 16, 1: 32}.get(itemsize, 8)  # sublane multiple for dtype

    tB = b_tile if b_tile is not None else sub
    if t_tile is not None:
        tT = t_tile
    else:
        # Keep each input tile <= ~4 MiB so double-buffered inputs stay well
        # under the scoped-VMEM budget on every generation (incl. v7x 64 MiB).
        budget = 4 * 1024 * 1024
        cap = max(sub, (budget // (tB * D * itemsize)) // sub * sub)
        tT = min(_round_up(T, sub), cap)

    Bp = _round_up(B, tB)
    Tp = _round_up(T, tT)

    # Zero-pad batch and time; padded rows get length 0 so they contribute
    # nothing and are sliced off below. Padded timesteps are masked anyway.
    x = jnp.pad(sequence_embeds, ((0, Bp - B), (0, Tp - T), (0, 0)))
    lens = jnp.pad(sequence_length.astype(jnp.int32), (0, Bp - B))

    grid_spec = pltpu.PrefetchScalarGridSpec(
        num_scalar_prefetch=1,
        grid=(Bp // tB, Tp // tT),
        in_specs=[pl.BlockSpec((tB, tT, D), lambda b, t, lens_ref: (b, t, 0))],
        out_specs=pl.BlockSpec((tB, D), lambda b, t, lens_ref: (b, 0)),
        scratch_shapes=[pltpu.VMEM((tB, D), jnp.float32)],
    )

    out = pl.pallas_call(
        _seq_pool_kernel,
        out_shape=jax.ShapeDtypeStruct((Bp, D), dtype),
        grid_spec=grid_spec,
        compiler_params=pltpu.CompilerParams(
            dimension_semantics=("parallel", "arbitrary"),
            vmem_limit_bytes=48 * 1024 * 1024,
        ),
    )(lens, x)
    return out[:B]


def sequence_pooling_ref(sequence_embeds, sequence_length):
    """Pure-JAX reference with the same semantics as the PyTorch module."""
    B, T, D = sequence_embeds.shape
    mask = (jnp.arange(T)[None, :] < sequence_length[:, None]).astype(jnp.float32)
    return jnp.sum(sequence_embeds.astype(jnp.float32) * mask[:, :, None],
                   axis=1).astype(sequence_embeds.dtype)


if __name__ == "__main__":
    key = jax.random.PRNGKey(0)
    k_embed, k_len, k_embed2, k_len2 = jax.random.split(key, 4)

    # Small shapes consistent with the module: batch=2, seq=8, hidden=32.
    B, T, D = 2, 8, 32
    sequence_embeds = jax.random.normal(k_embed, (B, T, D), dtype=jnp.float32)
    sequence_length = jax.random.randint(k_len, (B,), 1, T + 1, dtype=jnp.int32)

    out = jax.block_until_ready(sequence_pooling(sequence_embeds, sequence_length))
    ref = sequence_pooling_ref(sequence_embeds, sequence_length)
    assert out.shape == (B, D)
    assert jnp.allclose(out, ref, atol=1e-5, rtol=1e-5)

    # Exercise the multi-chunk reduction path (grid over T with the f32
    # accumulator + chunk skipping), still at small shapes.
    B2, T2, D2 = 4, 24, 32
    e2 = jax.random.normal(k_embed2, (B2, T2, D2), dtype=jnp.float32)
    l2 = jax.random.randint(k_len2, (B2,), 0, T2 + 1, dtype=jnp.int32)
    out2 = jax.block_until_ready(sequence_pooling(e2, l2, t_tile=8))
    ref2 = sequence_pooling_ref(e2, l2)
    assert out2.shape == (B2, D2)
    assert jnp.allclose(out2, ref2, atol=1e-5, rtol=1e-5)

    print("KERNEL_OK")
</pallas_src>

<mosaic_0001>
module attributes {stable_mosaic.version = 11 : i64} {
  func.func @_seq_pool_kernel(%arg0: i32, %arg1: i32, %arg2: memref<8xi32, #tpu.memory_space<smem>>, %arg3: memref<8x8x32xf32, #tpu.memory_space<vmem>>, %arg4: memref<8x32xf32, #tpu.memory_space<vmem>>, %arg5: memref<8x32xf32, #tpu.memory_space<vmem>>) attributes {dimension_semantics = [#tpu.dimension_semantics<parallel>, #tpu.dimension_semantics<arbitrary>], iteration_bounds = array<i64: 1, 1>, scalar_prefetch = 1 : i64, scratch_operands = 1 : i64, tpu.core_type = #tpu.core_type<tc>, window_params = [{transform_indices = @transform_0, window_bounds = array<i64: 8, 8, 32>}, {transform_indices = @transform_1, window_bounds = array<i64: 8, 32>}]} {
    %c8_i32 = arith.constant 8 : i32
    %0 = arith.muli %arg1, %c8_i32 : i32
    %c0_i32 = arith.constant 0 : i32
    %1 = arith.cmpi eq, %arg1, %c0_i32 : i32
    %2 = arith.extui %1 : i1 to i32
    %c0_i32_0 = arith.constant 0 : i32
    %3 = arith.cmpi ne, %2, %c0_i32_0 : i32
    scf.if %3 {
      %cst = arith.constant 0.000000e+00 : f32
      %66 = vector.broadcast %cst : f32 to vector<8x32xf32>
      %c0 = arith.constant 0 : index
      %c0_20 = arith.constant 0 : index
      %67 = vector.load %arg5[%c0, %c0_20] : memref<8x32xf32, #tpu.memory_space<vmem>>, vector<8x32xf32>
      tpu.vector_store %arg5[%c0, %c0_20], %66 {strides = array<i32>} : memref<8x32xf32, #tpu.memory_space<vmem>>, vector<8x32xf32>,
    } else {
    }
    %4 = tpu.iota {dimensions = array<i32: 0>} : vector<8x32xi32>
    %5 = vector.broadcast %0 : i32 to vector<8x32xi32>
    %6 = arith.addi %4, %5 : vector<8x32xi32>
    %c8_i32_1 = arith.constant 8 : i32
    %7 = arith.muli %arg0, %c8_i32_1 : i32
    %c0_i32_2 = arith.constant 0 : i32
    %8 = arith.addi %7, %c0_i32_2 : i32
    %9 = arith.index_cast %8 : i32 to index
    %10 = memref.load %arg2[%9] : memref<8xi32, #tpu.memory_space<smem>>
    %11 = arith.cmpi slt, %0, %10 : i32
    %12 = arith.extui %11 : i1 to i32
    %c0_i32_3 = arith.constant 0 : i32
    %13 = arith.cmpi ne, %12, %c0_i32_3 : i32
    scf.if %13 {
      %66 = vector.broadcast %10 : i32 to vector<8x32xi32>
      %67 = arith.cmpi slt, %6, %66 : vector<8x32xi32>
      %68 = arith.extui %67 : vector<8x32xi1> to vector<8x32xi32>
      %69 = arith.sitofp %68 : vector<8x32xi32> to vector<8x32xf32>
      %c0 = arith.constant 0 : index
      %c0_20 = arith.constant 0 : index
      %c0_21 = arith.constant 0 : index
      %70 = vector.load %arg3[%c0, %c0_20, %c0_21] : memref<8x8x32xf32, #tpu.memory_space<vmem>>, vector<1x8x32xf32>
      %71 = vector.shape_cast %70 : vector<1x8x32xf32> to vector<8x32xf32>
      %72 = arith.mulf %71, %69 : vector<8x32xf32>
      %cst = arith.constant dense<0.000000e+00> : vector<32xf32>
      %73 = vector.multi_reduction <add>, %72, %cst [0] : vector<8x32xf32> to vector<32xf32>
      %74 = vector.shape_cast %73 : vector<32xf32> to vector<1x32xf32>
      %c0_22 = arith.constant 0 : index
      %c0_23 = arith.constant 0 : index
      %75 = vector.load %arg5[%c0_22, %c0_23] : memref<8x32xf32, #tpu.memory_space<vmem>>, vector<1x32xf32>
      %76 = arith.addf %75, %74 : vector<1x32xf32>
      %c0_24 = arith.constant 0 : index
      %c0_25 = arith.constant 0 : index
      %77 = vector.load %arg5[%c0_24, %c0_25] : memref<8x32xf32, #tpu.memory_space<vmem>>, vector<1x32xf32>
      tpu.vector_store %arg5[%c0_24, %c0_25], %76 {strides = array<i32>} : memref<8x32xf32, #tpu.memory_space<vmem>>, vector<1x32xf32>,
    } else {
    }
    %c8_i32_4 = arith.constant 8 : i32
    %14 = arith.muli %arg0, %c8_i32_4 : i32
    %c1_i32 = arith.constant 1 : i32
    %15 = arith.addi %14, %c1_i32 : i32
    %16 = arith.index_cast %15 : i32 to index
    %17 = memref.load %arg2[%16] : memref<8xi32, #tpu.memory_space<smem>>
    %18 = arith.cmpi slt, %0, %17 : i32
    %19 = arith.extui %18 : i1 to i32
    %c0_i32_5 = arith.constant 0 : i32
    %20 = arith.cmpi ne, %19, %c0_i32_5 : i32
    scf.if %20 {
      %66 = vector.broadcast %17 : i32 to vector<8x32xi32>
      %67 = arith.cmpi slt, %6, %66 : vector<8x32xi32>
      %68 = arith.extui %67 : vector<8x32xi1> to vector<8x32xi32>
      %69 = arith.sitofp %68 : vector<8x32xi32> to vector<8x32xf32>
      %c1 = arith.constant 1 : index
      %c0 = arith.constant 0 : index
      %c0_20 = arith.constant 0 : index
      %70 = vector.load %arg3[%c1, %c0, %c0_20] : memref<8x8x32xf32, #tpu.memory_space<vmem>>, vector<1x8x32xf32>
      %71 = vector.shape_cast %70 : vector<1x8x32xf32> to vector<8x32xf32>
      %72 = arith.mulf %71, %69 : vector<8x32xf32>
      %cst = arith.constant dense<0.000000e+00> : vector<32xf32>
      %73 = vector.multi_reduction <add>, %72, %cst [0] : vector<8x32xf32> to vector<32xf32>
      %74 = vector.shape_cast %73 : vector<32xf32> to vector<1x32xf32>
      %c1_21 = arith.constant 1 : index
      %c0_22 = arith.constant 0 : index
      %75 = vector.load %arg5[%c1_21, %c0_22] : memref<8x32xf32, #tpu.memory_space<vmem>>, vector<1x32xf32>
      %76 = arith.addf %75, %74 : vector<1x32xf32>
      %c1_23 = arith.constant 1 : index
      %c0_24 = arith.constant 0 : index
      %77 = vector.load %arg5[%c1_23, %c0_24] : memref<8x32xf32, #tpu.memory_space<vmem>>, vector<1x32xf32>
      tpu.vector_store %arg5[%c1_23, %c0_24], %76 {strides = array<i32>} : memref<8x32xf32, #tpu.memory_space<vmem>>, vector<1x32xf32>,
    } else {
    }
    %c8_i32_6 = arith.constant 8 : i32
    %21 = arith.muli %arg0, %c8_i32_6 : i32
    %c2_i32 = arith.constant 2 : i32
    %22 = arith.addi %21, %c2_i32 : i32
    %23 = arith.index_cast %22 : i32 to index
    %24 = memref.load %arg2[%23] : memref<8xi32, #tpu.memory_space<smem>>
    %25 = arith.cmpi slt, %0, %24 : i32
    %26 = arith.extui %25 : i1 to i32
    %c0_i32_7 = arith.constant 0 : i32
    %27 = arith.cmpi ne, %26, %c0_i32_7 : i32
    scf.if %27 {
      %66 = vector.broadcast %24 : i32 to vector<8x32xi32>
      %67 = arith.cmpi slt, %6, %66 : vector<8x32xi32>
      %68 = arith.extui %67 : vector<8x32xi1> to vector<8x32xi32>
      %69 = arith.sitofp %68 : vector<8x32xi32> to vector<8x32xf32>
      %c2 = arith.constant 2 : index
      %c0 = arith.constant 0 : index
      %c0_20 = arith.constant 0 : index
      %70 = vector.load %arg3[%c2, %c0, %c0_20] : memref<8x8x32xf32, #tpu.memory_space<vmem>>, vector<1x8x32xf32>
      %71 = vector.shape_cast %70 : vector<1x8x32xf32> to vector<8x32xf32>
      %72 = arith.mulf %71, %69 : vector<8x32xf32>
      %cst = arith.constant dense<0.000000e+00> : vector<32xf32>
      %73 = vector.multi_reduction <add>, %72, %cst [0] : vector<8x32xf32> to vector<32xf32>
      %74 = vector.shape_cast %73 : vector<32xf32> to vector<1x32xf32>
      %c2_21 = arith.constant 2 : index
      %c0_22 = arith.constant 0 : index
      %75 = vector.load %arg5[%c2_21, %c0_22] : memref<8x32xf32, #tpu.memory_space<vmem>>, vector<1x32xf32>
      %76 = arith.addf %75, %74 : vector<1x32xf32>
      %c2_23 = arith.constant 2 : index
      %c0_24 = arith.constant 0 : index
      %77 = vector.load %arg5[%c2_23, %c0_24] : memref<8x32xf32, #tpu.memory_space<vmem>>, vector<1x32xf32>
      tpu.vector_store %arg5[%c2_23, %c0_24], %76 {strides = array<i32>} : memref<8x32xf32, #tpu.memory_space<vmem>>, vector<1x32xf32>,
    } else {
    }
    %c8_i32_8 = arith.constant 8 : i32
    %28 = arith.muli %arg0, %c8_i32_8 : i32
    %c3_i32 = arith.constant 3 : i32
    %29 = arith.addi %28, %c3_i32 : i32
    %30 = arith.index_cast %29 : i32 to index
    %31 = memref.load %arg2[%30] : memref<8xi32, #tpu.memory_space<smem>>
    %32 = arith.cmpi slt, %0, %31 : i32
    %33 = arith.extui %32 : i1 to i32
    %c0_i32_9 = arith.constant 0 : i32
    %34 = arith.cmpi ne, %33, %c0_i32_9 : i32
    scf.if %34 {
      %66 = vector.broadcast %31 : i32 to vector<8x32xi32>
      %67 = arith.cmpi slt, %6, %66 : vector<8x32xi32>
      %68 = arith.extui %67 : vector<8x32xi1> to vector<8x32xi32>
      %69 = arith.sitofp %68 : vector<8x32xi32> to vector<8x32xf32>
      %c3 = arith.constant 3 : index
      %c0 = arith.constant 0 : index
      %c0_20 = arith.constant 0 : index
      %70 = vector.load %arg3[%c3, %c0, %c0_20] : memref<8x8x32xf32, #tpu.memory_space<vmem>>, vector<1x8x32xf32>
      %71 = vector.shape_cast %70 : vector<1x8x32xf32> to vector<8x32xf32>
      %72 = arith.mulf %71, %69 : vector<8x32xf32>
      %cst = arith.constant dense<0.000000e+00> : vector<32xf32>
      %73 = vector.multi_reduction <add>, %72, %cst [0] : vector<8x32xf32> to vector<32xf32>
      %74 = vector.shape_cast %73 : vector<32xf32> to vector<1x32xf32>
      %c3_21 = arith.constant 3 : index
      %c0_22 = arith.constant 0 : index
      %75 = vector.load %arg5[%c3_21, %c0_22] : memref<8x32xf32, #tpu.memory_space<vmem>>, vector<1x32xf32>
      %76 = arith.addf %75, %74 : vector<1x32xf32>
      %c3_23 = arith.constant 3 : index
      %c0_24 = arith.constant 0 : index
      %77 = vector.load %arg5[%c3_23, %c0_24] : memref<8x32xf32, #tpu.memory_space<vmem>>, vector<1x32xf32>
      tpu.vector_store %arg5[%c3_23, %c0_24], %76 {strides = array<i32>} : memref<8x32xf32, #tpu.memory_space<vmem>>, vector<1x32xf32>,
    } else {
    }
    %c8_i32_10 = arith.constant 8 : i32
    %35 = arith.muli %arg0, %c8_i32_10 : i32
    %c4_i32 = arith.constant 4 : i32
    %36 = arith.addi %35, %c4_i32 : i32
    %37 = arith.index_cast %36 : i32 to index
    %38 = memref.load %arg2[%37] : memref<8xi32, #tpu.memory_space<smem>>
    %39 = arith.cmpi slt, %0, %38 : i32
    %40 = arith.extui %39 : i1 to i32
    %c0_i32_11 = arith.constant 0 : i32
    %41 = arith.cmpi ne, %40, %c0_i32_11 : i32
    scf.if %41 {
      %66 = vector.broadcast %38 : i32 to vector<8x32xi32>
      %67 = arith.cmpi slt, %6, %66 : vector<8x32xi32>
      %68 = arith.extui %67 : vector<8x32xi1> to vector<8x32xi32>
      %69 = arith.sitofp %68 : vector<8x32xi32> to vector<8x32xf32>
      %c4 = arith.constant 4 : index
      %c0 = arith.constant 0 : index
      %c0_20 = arith.constant 0 : index
      %70 = vector.load %arg3[%c4, %c0, %c0_20] : memref<8x8x32xf32, #tpu.memory_space<vmem>>, vector<1x8x32xf32>
      %71 = vector.shape_cast %70 : vector<1x8x32xf32> to vector<8x32xf32>
      %72 = arith.mulf %71, %69 : vector<8x32xf32>
      %cst = arith.constant dense<0.000000e+00> : vector<32xf32>
      %73 = vector.multi_reduction <add>, %72, %cst [0] : vector<8x32xf32> to vector<32xf32>
      %74 = vector.shape_cast %73 : vector<32xf32> to vector<1x32xf32>
      %c4_21 = arith.constant 4 : index
      %c0_22 = arith.constant 0 : index
      %75 = vector.load %arg5[%c4_21, %c0_22] : memref<8x32xf32, #tpu.memory_space<vmem>>, vector<1x32xf32>
      %76 = arith.addf %75, %74 : vector<1x32xf32>
      %c4_23 = arith.constant 4 : index
      %c0_24 = arith.constant 0 : index
      %77 = vector.load %arg5[%c4_23, %c0_24] : memref<8x32xf32, #tpu.memory_space<vmem>>, vector<1x32xf32>
      tpu.vector_store %arg5[%c4_23, %c0_24], %76 {strides = array<i32>} : memref<8x32xf32, #tpu.memory_space<vmem>>, vector<1x32xf32>,
    } else {
    }
    %c8_i32_12 = arith.constant 8 : i32
    %42 = arith.muli %arg0, %c8_i32_12 : i32
    %c5_i32 = arith.constant 5 : i32
    %43 = arith.addi %42, %c5_i32 : i32
    %44 = arith.index_cast %43 : i32 to index
    %45 = memref.load %arg2[%44] : memref<8xi32, #tpu.memory_space<smem>>
    %46 = arith.cmpi slt, %0, %45 : i32
    %47 = arith.extui %46 : i1 to i32
    %c0_i32_13 = arith.constant 0 : i32
    %48 = arith.cmpi ne, %47, %c0_i32_13 : i32
    scf.if %48 {
      %66 = vector.broadcast %45 : i32 to vector<8x32xi32>
      %67 = arith.cmpi slt, %6, %66 : vector<8x32xi32>
      %68 = arith.extui %67 : vector<8x32xi1> to vector<8x32xi32>
      %69 = arith.sitofp %68 : vector<8x32xi32> to vector<8x32xf32>
      %c5 = arith.constant 5 : index
      %c0 = arith.constant 0 : index
      %c0_20 = arith.constant 0 : index
      %70 = vector.load %arg3[%c5, %c0, %c0_20] : memref<8x8x32xf32, #tpu.memory_space<vmem>>, vector<1x8x32xf32>
      %71 = vector.shape_cast %70 : vector<1x8x32xf32> to vector<8x32xf32>
      %72 = arith.mulf %71, %69 : vector<8x32xf32>
      %cst = arith.constant dense<0.000000e+00> : vector<32xf32>
      %73 = vector.multi_reduction <add>, %72, %cst [0] : vector<8x32xf32> to vector<32xf32>
      %74 = vector.shape_cast %73 : vector<32xf32> to vector<1x32xf32>
      %c5_21 = arith.constant 5 : index
      %c0_22 = arith.constant 0 : index
      %75 = vector.load %arg5[%c5_21, %c0_22] : memref<8x32xf32, #tpu.memory_space<vmem>>, vector<1x32xf32>
      %76 = arith.addf %75, %74 : vector<1x32xf32>
      %c5_23 = arith.constant 5 : index
      %c0_24 = arith.constant 0 : index
      %77 = vector.load %arg5[%c5_23, %c0_24] : memref<8x32xf32, #tpu.memory_space<vmem>>, vector<1x32xf32>
      tpu.vector_store %arg5[%c5_23, %c0_24], %76 {strides = array<i32>} : memref<8x32xf32, #tpu.memory_space<vmem>>, vector<1x32xf32>,
    } else {
    }
    %c8_i32_14 = arith.constant 8 : i32
    %49 = arith.muli %arg0, %c8_i32_14 : i32
    %c6_i32 = arith.constant 6 : i32
    %50 = arith.addi %49, %c6_i32 : i32
    %51 = arith.index_cast %50 : i32 to index
    %52 = memref.load %arg2[%51] : memref<8xi32, #tpu.memory_space<smem>>
    %53 = arith.cmpi slt, %0, %52 : i32
    %54 = arith.extui %53 : i1 to i32
    %c0_i32_15 = arith.constant 0 : i32
    %55 = arith.cmpi ne, %54, %c0_i32_15 : i32
    scf.if %55 {
      %66 = vector.broadcast %52 : i32 to vector<8x32xi32>
      %67 = arith.cmpi slt, %6, %66 : vector<8x32xi32>
      %68 = arith.extui %67 : vector<8x32xi1> to vector<8x32xi32>
      %69 = arith.sitofp %68 : vector<8x32xi32> to vector<8x32xf32>
      %c6 = arith.constant 6 : index
      %c0 = arith.constant 0 : index
      %c0_20 = arith.constant 0 : index
      %70 = vector.load %arg3[%c6, %c0, %c0_20] : memref<8x8x32xf32, #tpu.memory_space<vmem>>, vector<1x8x32xf32>
      %71 = vector.shape_cast %70 : vector<1x8x32xf32> to vector<8x32xf32>
      %72 = arith.mulf %71, %69 : vector<8x32xf32>
      %cst = arith.constant dense<0.000000e+00> : vector<32xf32>
      %73 = vector.multi_reduction <add>, %72, %cst [0] : vector<8x32xf32> to vector<32xf32>
      %74 = vector.shape_cast %73 : vector<32xf32> to vector<1x32xf32>
      %c6_21 = arith.constant 6 : index
      %c0_22 = arith.constant 0 : index
      %75 = vector.load %arg5[%c6_21, %c0_22] : memref<8x32xf32, #tpu.memory_space<vmem>>, vector<1x32xf32>
      %76 = arith.addf %75, %74 : vector<1x32xf32>
      %c6_23 = arith.constant 6 : index
      %c0_24 = arith.constant 0 : index
      %77 = vector.load %arg5[%c6_23, %c0_24] : memref<8x32xf32, #tpu.memory_space<vmem>>, vector<1x32xf32>
      tpu.vector_store %arg5[%c6_23, %c0_24], %76 {strides = array<i32>} : memref<8x32xf32, #tpu.memory_space<vmem>>, vector<1x32xf32>,
    } else {
    }
    %c8_i32_16 = arith.constant 8 : i32
    %56 = arith.muli %arg0, %c8_i32_16 : i32
    %c7_i32 = arith.constant 7 : i32
    %57 = arith.addi %56, %c7_i32 : i32
    %58 = arith.index_cast %57 : i32 to index
    %59 = memref.load %arg2[%58] : memref<8xi32, #tpu.memory_space<smem>>
    %60 = arith.cmpi slt, %0, %59 : i32
    %61 = arith.extui %60 : i1 to i32
    %c0_i32_17 = arith.constant 0 : i32
    %62 = arith.cmpi ne, %61, %c0_i32_17 : i32
    scf.if %62 {
      %66 = vector.broadcast %59 : i32 to vector<8x32xi32>
      %67 = arith.cmpi slt, %6, %66 : vector<8x32xi32>
      %68 = arith.extui %67 : vector<8x32xi1> to vector<8x32xi32>
      %69 = arith.sitofp %68 : vector<8x32xi32> to vector<8x32xf32>
      %c7 = arith.constant 7 : index
      %c0 = arith.constant 0 : index
      %c0_20 = arith.constant 0 : index
      %70 = vector.load %arg3[%c7, %c0, %c0_20] : memref<8x8x32xf32, #tpu.memory_space<vmem>>, vector<1x8x32xf32>
      %71 = vector.shape_cast %70 : vector<1x8x32xf32> to vector<8x32xf32>
      %72 = arith.mulf %71, %69 : vector<8x32xf32>
      %cst = arith.constant dense<0.000000e+00> : vector<32xf32>
      %73 = vector.multi_reduction <add>, %72, %cst [0] : vector<8x32xf32> to vector<32xf32>
      %74 = vector.shape_cast %73 : vector<32xf32> to vector<1x32xf32>
      %c7_21 = arith.constant 7 : index
      %c0_22 = arith.constant 0 : index
      %75 = vector.load %arg5[%c7_21, %c0_22] : memref<8x32xf32, #tpu.memory_space<vmem>>, vector<1x32xf32>
      %76 = arith.addf %75, %74 : vector<1x32xf32>
      %c7_23 = arith.constant 7 : index
      %c0_24 = arith.constant 0 : index
      %77 = vector.load %arg5[%c7_23, %c0_24] : memref<8x32xf32, #tpu.memory_space<vmem>>, vector<1x32xf32>
      tpu.vector_store %arg5[%c7_23, %c0_24], %76 {strides = array<i32>} : memref<8x32xf32, #tpu.memory_space<vmem>>, vector<1x32xf32>,
    } else {
    }
    %c0_i32_18 = arith.constant 0 : i32
    %63 = arith.cmpi eq, %arg1, %c0_i32_18 : i32
    %64 = arith.extui %63 : i1 to i32
    %c0_i32_19 = arith.constant 0 : i32
    %65 = arith.cmpi ne, %64, %c0_i32_19 : i32
    scf.if %65 {
      %c0 = arith.constant 0 : index
      %c0_20 = arith.constant 0 : index
      %66 = vector.load %arg5[%c0, %c0_20] : memref<8x32xf32, #tpu.memory_space<vmem>>, vector<8x32xf32>
      %c0_21 = arith.constant 0 : index
      %c0_22 = arith.constant 0 : index
      %67 = vector.load %arg4[%c0_21, %c0_22] : memref<8x32xf32, #tpu.memory_space<vmem>>, vector<8x32xf32>
      tpu.vector_store %arg4[%c0_21, %c0_22], %66 {strides = array<i32>} : memref<8x32xf32, #tpu.memory_space<vmem>>, vector<8x32xf32>,
    } else {
    }
    return
  }
  func.func @transform_0(%arg0: i32, %arg1: i32, %arg2: memref<8xi32, #tpu.memory_space<smem>>) -> (i32, i32, i32) {
    %c0_i32 = arith.constant 0 : i32
    %c0_i32_0 = arith.constant 0 : i32
    return %arg0, %arg1, %c0_i32 : i32, i32, i32
  }
  func.func @transform_1(%arg0: i32, %arg1: i32, %arg2: memref<8xi32, #tpu.memory_space<smem>>) -> (i32, i32) {
    %c0_i32 = arith.constant 0 : i32
    %c0_i32_0 = arith.constant 0 : i32
    return %arg0, %c0_i32 : i32, i32
  }
}

</mosaic_0001>

<bundles_post_ra>
// kernel: tpu_custom_call.1
= control target key start
LH: loop header
LB: loop body
LE: loop exit
PB: predicated region body
PF: predicated region fallthrough
CT: control target
= control target key end

     0   :  { %s358_s9 = smov [#allocation4]   ;;  %s416_s0 = inlined_call_operand.hbm [shape: s32[8], index: 0, kind: input, shape index: {}]   ;;  %s417_s1 = inlined_call_operand.hbm [shape: f32[8,8,32], index: 1, kind: input, shape index: {}]   ;;  %s418_s2 = inlined_call_operand.hbm [shape: f32[8,32], index: 2, kind: output, shape index: {}]  }
   0x1   :  { %8 = dma.hbm_to_smem %s416_s0, 16, %s358_s9, [#allocation3] }
   0x2   :  { %352 = dma.done.wait [#allocation3], 16 }
   0x3   :  { %353 = vsyncadd [#allocation3], 4294967280 }
   0x4   :  { %10 = sfence }
   0x5   :  { %11 = vsyncpa [#allocation6], 0 }
   0x6   :  { %12 = vsyncpa [#allocation7], 0  ;;  %s359_s12 = smov [#allocation5]  }
   0x7   :  { %s18_s13 = sshll.u32 %s359_s12, 4  ;;  %s19_s13 = int_to_ptr.vmem [resolvable:$true] %s18_s13 }
   0x8   :  { %s320_s14 = scalar_lea.vmem %s19_s13, 1024  ;;  %p325_p1 = scmp.lt.s32.totalorder %s19_s13, %s19_s13 }
   0x9   :  { %p321_p0 = scmp.ne.s32.totalorder %s19_s13, %s320_s14  ;;  %p326_p2 = scmp.lt.s32.totalorder %s320_s14, %s320_s14 }
   0xb   :  { %p327_p3 = por %p326_p2, %p325_p1 }
   0xd   :  { %p328_p4 = pnand %p327_p3, %p321_p0 }
   0xf   :  { %331 = shalt.err (!%p328_p4)
}
  0x10   :  { %s360_s15 = smov 128   ;;  %s361_s16 = smov 8  }
  0x11   :  { %24 = dma.hbm_to_vmem [thread:$0]  %s417_s1, 1024, %s19_s13, [#allocation6], %s360_s15, %s360_s15, %s361_s16  }
  0x12   :  { %354 = dma.done.wait [#allocation6], 1024  }
  0x13   :  { %355 = vsyncadd [#allocation6], 4294966272  ;;  %vm33_vm0 = vcmask 261120   ;;  %v35_v0 = vlaneseq  ;;  %s40_s0 = sld [smem:[#allocation4]]  ;;  %v362_v1 = vmov 0.0  }
  0x14   :  { %34 = vst.msk [vmem:[#allocation2] sm:$0xff] %vm33_vm0, %v362_v1 }
  0x15   :  { %v394_v2 = vshrl.u32 %v35_v0, 7 }
  0x19   :  { %p260_p5 = scmp.le.s32.totalorder %s40_s0, 0 }
  0x1b   :  { %44 = sbr.rel (%p260_p5) target bundleno = 53 (0x35), region = 17 }
  0x20   :  { %v45_v3 = vstv %s40_s0  ;;  %v49_v4 = vld [vmem:[#allocation5] sm:$0xff]  ;;  %v363_v5 = vmov 0.0   ;;  %v59_v14 = vld [vmem:[#allocation2] sm:$0x1]  ;;  %vm61_vm2 = vcmask 253952  }
  0x21   :  { %vm46_vm1 = vcmp.lt.s32.totalorder %v394_v2, %v45_v3 }
  0x22   :  { %v261_v6 = vsel %vm46_vm1, 1.0, %v363_v5 }
  0x23   :  { %v50_v7 = vmul.f32 %v261_v6, %v49_v4 }
  0x25   :  { %v52_v8 = vsel %vm33_vm0, %v50_v7, 0.0 }
  0x26   :  { %v53_v9 = vrot.slane %v52_v8, 4 }
  0x28   :  { %v54_v10 = vadd.f32 %v53_v9, %v52_v8 }
  0x2a   :  { %v55_v11 = vrot.slane %v54_v10, 2 }
  0x2c   :  { %v56_v12 = vadd.f32 %v55_v11, %v54_v10 }
  0x2e   :  { %v57_v13 = vrot.slane %v56_v12, 1 }
  0x30   :  { %v58_v15 = vadd.f32 %v57_v13, %v56_v12 }
  0x32   :  { %v60_v16 = vadd.f32 %v59_v14, %v58_v15 }
  0x34   :  { %62 = vst.msk [vmem:[#allocation2] sm:$0x1] %vm61_vm2, %v60_v16 }
  0x35 PF:  { %s262_s1 = sld [smem:[#allocation4 + $0x1]] }
  0x3b   :  { %p264_p6 = scmp.le.s32.totalorder %s262_s1, 0 }
  0x3d   :  { %68 = sbr.rel (%p264_p6) target bundleno = 87 (0x57), region = 21 }
  0x42   :  { %v69_v17 = vstv %s262_s1  ;;  %v74_v18 = vld [vmem:[#allocation5 + $0x8] sm:$0xff]  ;;  %v364_v19 = vmov 0.0   ;;  %v84_v28 = vld [vmem:[#allocation2 + $0x1] sm:$0x1]  ;;  %vm86_vm4 = vcmask 253952  }
  0x43   :  { %vm70_vm3 = vcmp.lt.s32.totalorder %v394_v2, %v69_v17 }
  0x44   :  { %v265_v20 = vsel %vm70_vm3, 1.0, %v364_v19 }
  0x45   :  { %v75_v21 = vmul.f32 %v265_v20, %v74_v18 }
  0x47   :  { %v77_v22 = vsel %vm33_vm0, %v75_v21, 0.0 }
  0x48   :  { %v78_v23 = vrot.slane %v77_v22, 4 }
  0x4a   :  { %v79_v24 = vadd.f32 %v78_v23, %v77_v22 }
  0x4c   :  { %v80_v25 = vrot.slane %v79_v24, 2 }
  0x4e   :  { %v81_v26 = vadd.f32 %v80_v25, %v79_v24 }
  0x50   :  { %v82_v27 = vrot.slane %v81_v26, 1 }
  0x52   :  { %v83_v29 = vadd.f32 %v82_v27, %v81_v26 }
  0x54   :  { %v85_v30 = vadd.f32 %v84_v28, %v83_v29 }
  0x56   :  { %87 = vst.msk [vmem:[#allocation2 + $0x1] sm:$0x1] %vm86_vm4, %v85_v30 }
  0x57 PF:  { %s266_s19 = sld [smem:[#allocation4 + $0x2]] }
  0x5d   :  { %p268_p7 = scmp.le.s32.totalorder %s266_s19, 0 }
  0x5f   :  { %93 = sbr.rel (%p268_p7) target bundleno = 121 (0x79), region = 25 }
  0x64   :  { %v94_v31 = vstv %s266_s19  ;;  %v99_v32 = vld [vmem:[#allocation5 + $0x10] sm:$0xff]  ;;  %v365_v33 = vmov 0.0   ;;  %v109_v42 = vld [vmem:[#allocation2 + $0x2] sm:$0x1]  ;;  %vm111_vm6 = vcmask 253952  }
  0x65   :  { %vm95_vm5 = vcmp.lt.s32.totalorder %v394_v2, %v94_v31 }
  0x66   :  { %v269_v34 = vsel %vm95_vm5, 1.0, %v365_v33 }
  0x67   :  { %v100_v35 = vmul.f32 %v269_v34, %v99_v32 }
  0x69   :  { %v102_v36 = vsel %vm33_vm0, %v100_v35, 0.0 }
  0x6a   :  { %v103_v37 = vrot.slane %v102_v36, 4 }
  0x6c   :  { %v104_v38 = vadd.f32 %v103_v37, %v102_v36 }
  0x6e   :  { %v105_v39 = vrot.slane %v104_v38, 2 }
  0x70   :  { %v106_v40 = vadd.f32 %v105_v39, %v104_v38 }
  0x72   :  { %v107_v41 = vrot.slane %v106_v40, 1 }
  0x74   :  { %v108_v43 = vadd.f32 %v107_v41, %v106_v40 }
  0x76   :  { %v110_v44 = vadd.f32 %v109_v42, %v108_v43 }
  0x78   :  { %112 = vst.msk [vmem:[#allocation2 + $0x2] sm:$0x1] %vm111_vm6, %v110_v44 }
  0x79 PF:  { %s270_s20 = sld [smem:[#allocation4 + $0x3]] }
  0x7f   :  { %p272_p8 = scmp.le.s32.totalorder %s270_s20, 0 }
  0x81   :  { %118 = sbr.rel (%p272_p8) target bundleno = 155 (0x9b), region = 29 }
  0x86   :  { %v119_v45 = vstv %s270_s20  ;;  %v124_v46 = vld [vmem:[#allocation5 + $0x18] sm:$0xff]  ;;  %v366_v47 = vmov 0.0   ;;  %vm136_vm8 = vcmask 253952  }
  0x87   :  { %vm120_vm7 = vcmp.lt.s32.totalorder %v394_v2, %v119_v45  ;;  %v134_v56 = vld [vmem:[#allocation2 + $0x3] sm:$0x1] }
  0x88   :  { %v273_v48 = vsel %vm120_vm7, 1.0, %v366_v47 }
  0x89   :  { %v125_v49 = vmul.f32 %v273_v48, %v124_v46 }
  0x8b   :  { %v127_v50 = vsel %vm33_vm0, %v125_v49, 0.0 }
  0x8c   :  { %v128_v51 = vrot.slane %v127_v50, 4 }
  0x8e   :  { %v129_v52 = vadd.f32 %v128_v51, %v127_v50 }
  0x90   :  { %v130_v53 = vrot.slane %v129_v52, 2 }
  0x92   :  { %v131_v54 = vadd.f32 %v130_v53, %v129_v52 }
  0x94   :  { %v132_v55 = vrot.slane %v131_v54, 1 }
  0x96   :  { %v133_v57 = vadd.f32 %v132_v55, %v131_v54 }
  0x98   :  { %v135_v58 = vadd.f32 %v134_v56, %v133_v57 }
  0x9a   :  { %137 = vst.msk [vmem:[#allocation2 + $0x3] sm:$0x1] %vm136_vm8, %v135_v58 }
  0x9b PF:  { %s274_s21 = sld [smem:[#allocation4 + $0x4]] }
  0xa1   :  { %p276_p9 = scmp.le.s32.totalorder %s274_s21, 0 }
  0xa3   :  { %143 = sbr.rel (%p276_p9) target bundleno = 189 (0xbd), region = 33 }
  0xa8   :  { %v144_v59 = vstv %s274_s21  ;;  %v149_v60 = vld [vmem:[#allocation5 + $0x20] sm:$0xff]  ;;  %v367_v61 = vmov 0.0   ;;  %v159_v7 = vld [vmem:[#allocation2 + $0x4] sm:$0x1]  ;;  %vm161_vm10 = vcmask 253952  }
  0xa9   :  { %vm145_vm9 = vcmp.lt.s32.totalorder %v394_v2, %v144_v59 }
  0xaa   :  { %v277_v62 = vsel %vm145_vm9, 1.0, %v367_v61 }
  0xab   :  { %v150_v63 = vmul.f32 %v277_v62, %v149_v60 }
  0xad   :  { %v152_v0 = vsel %vm33_vm0, %v150_v63, 0.0 }
  0xae   :  { %v153_v1 = vrot.slane %v152_v0, 4 }
  0xb0   :  { %v154_v3 = vadd.f32 %v153_v1, %v152_v0 }
  0xb2   :  { %v155_v4 = vrot.slane %v154_v3, 2 }
  0xb4   :  { %v156_v5 = vadd.f32 %v155_v4, %v154_v3 }
  0xb6   :  { %v157_v6 = vrot.slane %v156_v5, 1 }
  0xb8   :  { %v158_v8 = vadd.f32 %v157_v6, %v156_v5 }
  0xba   :  { %v160_v9 = vadd.f32 %v159_v7, %v158_v8 }
  0xbc   :  { %162 = vst.msk [vmem:[#allocation2 + $0x4] sm:$0x1] %vm161_vm10, %v160_v9 }
  0xbd PF:  { %s278_s22 = sld [smem:[#allocation4 + $0x5]] }
  0xc3   :  { %p280_p10 = scmp.le.s32.totalorder %s278_s22, 0 }
  0xc5   :  { %168 = sbr.rel (%p280_p10) target bundleno = 223 (0xdf), region = 37 }
  0xca   :  { %v169_v10 = vstv %s278_s22  ;;  %v174_v11 = vld [vmem:[#allocation5 + $0x28] sm:$0xff]  ;;  %v368_v12 = vmov 0.0   ;;  %v184_v21 = vld [vmem:[#allocation2 + $0x5] sm:$0x1]  ;;  %vm186_vm12 = vcmask 253952  }
  0xcb   :  { %vm170_vm11 = vcmp.lt.s32.totalorder %v394_v2, %v169_v10 }
  0xcc   :  { %v281_v13 = vsel %vm170_vm11, 1.0, %v368_v12 }
  0xcd   :  { %v175_v14 = vmul.f32 %v281_v13, %v174_v11 }
  0xcf   :  { %v177_v15 = vsel %vm33_vm0, %v175_v14, 0.0 }
  0xd0   :  { %v178_v16 = vrot.slane %v177_v15, 4 }
  0xd2   :  { %v179_v17 = vadd.f32 %v178_v16, %v177_v15 }
  0xd4   :  { %v180_v18 = vrot.slane %v179_v17, 2 }
  0xd6   :  { %v181_v19 = vadd.f32 %v180_v18, %v179_v17 }
  0xd8   :  { %v182_v20 = vrot.slane %v181_v19, 1 }
  0xda   :  { %v183_v22 = vadd.f32 %v182_v20, %v181_v19 }
  0xdc   :  { %v185_v23 = vadd.f32 %v184_v21, %v183_v22 }
  0xde   :  { %187 = vst.msk [vmem:[#allocation2 + $0x5] sm:$0x1] %vm186_vm12, %v185_v23 }
  0xdf PF:  { %s282_s23 = sld [smem:[#allocation4 + $0x6]] }
  0xe5   :  { %p284_p11 = scmp.le.s32.totalorder %s282_s23, 0 }
  0xe7   :  { %193 = sbr.rel (%p284_p11) target bundleno = 257 (0x101), region = 41 }
  0xec   :  { %v194_v24 = vstv %s282_s23  ;;  %v199_v25 = vld [vmem:[#allocation5 + $0x30] sm:$0xff]  ;;  %v369_v26 = vmov 0.0   ;;  %v209_v35 = vld [vmem:[#allocation2 + $0x6] sm:$0x1]  ;;  %vm211_vm14 = vcmask 253952  }
  0xed   :  { %vm195_vm13 = vcmp.lt.s32.totalorder %v394_v2, %v194_v24 }
  0xee   :  { %v285_v27 = vsel %vm195_vm13, 1.0, %v369_v26 }
  0xef   :  { %v200_v28 = vmul.f32 %v285_v27, %v199_v25 }
  0xf1   :  { %v202_v29 = vsel %vm33_vm0, %v200_v28, 0.0 }
  0xf2   :  { %v203_v30 = vrot.slane %v202_v29, 4 }
  0xf4   :  { %v204_v31 = vadd.f32 %v203_v30, %v202_v29 }
  0xf6   :  { %v205_v32 = vrot.slane %v204_v31, 2 }
  0xf8   :  { %v206_v33 = vadd.f32 %v205_v32, %v204_v31 }
  0xfa   :  { %v207_v34 = vrot.slane %v206_v33, 1 }
  0xfc   :  { %v208_v36 = vadd.f32 %v207_v34, %v206_v33 }
  0xfe   :  { %v210_v37 = vadd.f32 %v209_v35, %v208_v36 }
 0x100   :  { %212 = vst.msk [vmem:[#allocation2 + $0x6] sm:$0x1] %vm211_vm14, %v210_v37 }
 0x101 PF:  { %s286_s24 = sld [smem:[#allocation4 + $0x7]] }
 0x107   :  { %p288_p12 = scmp.le.s32.totalorder %s286_s24, 0 }
 0x109   :  { %218 = sbr.rel (%p288_p12) target bundleno = 291 (0x123), region = 45 }
 0x10e   :  { %v219_v38 = vstv %s286_s24  ;;  %v224_v39 = vld [vmem:[#allocation5 + $0x38] sm:$0xff]  ;;  %v370_v40 = vmov 0.0   ;;  %vm236_vm1 = vcmask 253952  }
 0x10f   :  { %vm220_vm15 = vcmp.lt.s32.totalorder %v394_v2, %v219_v38  ;;  %v234_v49 = vld [vmem:[#allocation2 + $0x7] sm:$0x1] }
 0x110   :  { %v289_v41 = vsel %vm220_vm15, 1.0, %v370_v40 }
 0x111   :  { %v225_v42 = vmul.f32 %v289_v41, %v224_v39 }
 0x113   :  { %v227_v43 = vsel %vm33_vm0, %v225_v42, 0.0 }
 0x114   :  { %v228_v44 = vrot.slane %v227_v43, 4 }
 0x116   :  { %v229_v45 = vadd.f32 %v228_v44, %v227_v43 }
 0x118   :  { %v230_v46 = vrot.slane %v229_v45, 2 }
 0x11a   :  { %v231_v47 = vadd.f32 %v230_v46, %v229_v45 }
 0x11c   :  { %v232_v48 = vrot.slane %v231_v47, 1 }
 0x11e   :  { %v233_v50 = vadd.f32 %v232_v48, %v231_v47 }
 0x120   :  { %v235_v51 = vadd.f32 %v234_v49, %v233_v50 }
 0x122   :  { %237 = vst.msk [vmem:[#allocation2 + $0x7] sm:$0x1] %vm236_vm1, %v235_v51 }
 0x123 PF:  { %s371_s25 = smov [#allocation8]  }
 0x124   :  { %s250_s26 = sshll.u32 %s371_s25, 4  ;;  %s251_s26 = int_to_ptr.vmem [resolvable:$true] %s250_s26 }
 0x125   :  { %s332_s27 = scalar_lea.vmem %s251_s26, 128  ;;  %p337_p0 = scmp.lt.s32.totalorder %s251_s26, %s251_s26 }
 0x126   :  { %p333_p13 = scmp.ne.s32.totalorder %s251_s26, %s332_s27  ;;  %p338_p1 = scmp.lt.s32.totalorder %s332_s27, %s332_s27 }
 0x128   :  { %p339_p2 = por %p338_p1, %p337_p0 }
 0x129   :  { %v241_v52 = vld [vmem:[#allocation2] sm:$0xff] }
 0x12a   :  { %243 = vst.msk [vmem:[#allocation8] sm:$0xff] %vm33_vm0, %v241_v52  ;;  %p340_p3 = pnand %p339_p2, %p333_p13 }
 0x12c   :  { %343 = shalt.err (!%p340_p3)
}
 0x12d   :  { %253 = dma.vmem_to_hbm [thread:$0]  %s251_s26, 128, %s418_s2, [#allocation7]  }
 0x12e   :  { %356 = dma.done.wait [#allocation7], 128  }
 0x12f   :  { %357 = vsyncadd [#allocation7], 4294967168 }
 0x130   :  { %257 = vsyncpa [#allocation6], 1 }
 0x131   :  { %258 = vsyncpa [#allocation7], 1 }

</bundles_post_ra>
